<compile_context>
chip_gen: v7x
topology: tpu7x:2x2x1
jax: 0.10.0
libtpu: 0.0.40
codegen_flags: <defaults>
</compile_context>

<pallas_src>
import functools

import jax
import jax.numpy as jnp
from jax import lax
from jax.experimental import pallas as pl
from jax.experimental.pallas import tpu as pltpu


def _softkmeans_kernel(x_ref, nc_ref, csq_ref, o_ref, *, neg_inv_temp):
    """x_ref: (TM, D)  nc_ref: (K, D) = -2*centroids  csq_ref: (K, 1)
    o_ref: (K, TM) lane-dense transposed soft assignments."""
    x = x_ref[...].astype(jnp.float32)          # (TM, D)
    neg2c = nc_ref[...]                         # (K, D) f32, hoisted -2*centroids
    c_sq = csq_ref[...]                         # (K, 1) f32, hoisted ||c||^2

    # Cross term on the MXU: s[k, n] = sum_d (-2*c[k, d]) * x[n, d] -> (K, TM)
    # (contract last dim of both operands; no explicit transpose materialised)
    dims = (((1,), (1,)), ((), ()))
    s = lax.dot_general(neg2c, x, dims, preferred_element_type=jnp.float32)

    # ||x_n||^2 as a lane-dense (1, TM) row via a tiny matmul (MXU is idle).
    ones_row = jnp.ones((1, x.shape[1]), jnp.float32)
    x_sq = lax.dot_general(ones_row, x * x, dims,
                           preferred_element_type=jnp.float32)       # (1, TM)

    d2 = jnp.maximum(c_sq + (x_sq + s), 0.0)     # guard tiny negatives
    dist = jnp.sqrt(d2)                          # Euclidean distance (p=2)

    logits = dist * neg_inv_temp                 # == -dist / temperature
    # Numerically stable softmax over the cluster (sublane) axis.
    m = jnp.max(logits, axis=0, keepdims=True)   # (1, TM)
    e = jnp.exp(logits - m)                      # (K, TM)
    denom = jnp.sum(e, axis=0, keepdims=True)    # (1, TM), in [1, K]
    # Approx reciprocal on the EUP + one Newton step on the VPU (holds 1e-5).
    r = pl.reciprocal(denom, approx=True)
    r = r * (2.0 - denom * r)
    o_ref[...] = (e * r).astype(o_ref.dtype)


def _round_up(v, m):
    return ((v + m - 1) // m) * m


def _pick_tile(n, d, k, x_itemsize):
    """N-tile sized by bytes (>= ~1 MiB of HBM traffic per x tile), capped by
    a VMEM budget that accounts for the 128-lane padding of the (tm, D<128)
    block and the in-kernel f32 working copies."""
    if n <= 1024:
        return n                          # single grid step, block == full array
    lanes = _round_up(d, 128)
    # Per-row VMEM bytes: double-buffered x tile (lane-padded, native dtype)
    # + ~2 lane-padded f32 working copies (cast / x*x)
    # + double-buffered (K, tm) f32 output + ~4 (K, tm) f32 intermediates.
    per_row = 2 * lanes * x_itemsize + 2 * lanes * 4 + 6 * k * 4
    vmem_cap_rows = max(((24 << 20) // per_row) // 128 * 128, 256)
    # >= ~1 MiB of real HBM traffic per x tile to amortise ~0.35us/step.
    traffic_rows = _round_up(max((1 << 20) // max(d * x_itemsize, 1), 1024), 128)
    tm = min(traffic_rows, vmem_cap_rows)
    # Keep >= ~8 grid steps when N is large (pipelining + megacore on v7x).
    if n >= 8 * 1024:
        tm = min(tm, max(1024, _round_up(pl.cdiv(n, 8), 128)))
    return max(min(tm, _round_up(n, 128)), 128)


def soft_kmeans_forward(x, centroids, temperature=1.0, *, tm=None,
                        transposed_output=False):
    n, d = x.shape
    k, dc = centroids.shape
    assert d == dc

    if tm is None:
        tm = _pick_tile(n, d, k, x.dtype.itemsize)
    elif tm >= n:
        tm = n
    else:
        tm = max(128, _round_up(tm, 128))   # legal sublane multiple for any dtype

    grid = pl.cdiv(n, tm)                   # ragged last block handled by Pallas

    # Hoisted centroid-side quantities, computed once outside the grid loop.
    c_f32 = centroids.astype(jnp.float32)
    neg2c = -2.0 * c_f32                                       # (K, D)
    c_sq = jnp.sum(c_f32 * c_f32, axis=-1, keepdims=True)      # (K, 1)

    kernel = functools.partial(
        _softkmeans_kernel, neg_inv_temp=-1.0 / float(temperature)
    )

    # VMEM footprint estimate with lane padding of the (tm, D) blocks and the
    # in-kernel f32 working copies; capped at 48 MiB (headroom on v7x 64 MiB).
    lanes = _round_up(d, 128)
    est = (2 * tm * lanes * x.dtype.itemsize    # x tile, double-buffered, padded
           + 2 * tm * lanes * 4                 # f32 working copies (cast, x*x)
           + 2 * k * tm * 4                     # (K, tm) output, double-buffered
           + 4 * k * tm * 4                     # (K, tm) intermediates
           + 4 * max(k, 8) * lanes * 4)         # resident centroids / norms
    vmem_limit = int(min(48 << 20, max(est + est // 2, 16 << 20)))

    out_t = pl.pallas_call(
        kernel,
        out_shape=jax.ShapeDtypeStruct((k, n), jnp.float32),
        grid_spec=pltpu.PrefetchScalarGridSpec(
            num_scalar_prefetch=0,
            grid=(grid,),
            in_specs=[
                pl.BlockSpec((tm, d), lambda i: (i, 0)),   # x tile
                pl.BlockSpec((k, d), lambda i: (0, 0)),    # -2*centroids (resident)
                pl.BlockSpec((k, 1), lambda i: (0, 0)),    # ||c||^2 (resident)
            ],
            out_specs=pl.BlockSpec((k, tm), lambda i: (0, i)),  # lane-dense out
        ),
        compiler_params=pltpu.CompilerParams(
            dimension_semantics=("parallel",),   # N-grid shards across TCs
            vmem_limit_bytes=vmem_limit,
        ),
    )(x, neg2c, c_sq)

    if transposed_output:
        return out_t            # (K, N) lane-dense layout, no extra HBM pass
    # Layout plumbing back to the reference (N, K) orientation.
    return out_t.T


def soft_kmeans_reference(x, centroids, temperature=1.0):
    # Pure-JAX reference mirroring the PyTorch module.
    diff = x[:, None, :] - centroids[None, :, :]
    dist = jnp.sqrt(jnp.sum(diff * diff, axis=-1))
    return jax.nn.softmax(-dist / temperature, axis=1)


if __name__ == "__main__":
    num_clusters = 8
    feature_dim = 32
    temperature = 1.0

    key = jax.random.PRNGKey(0)
    kx, kc, kx2 = jax.random.split(key, 3)
    centroids = jax.random.normal(kc, (num_clusters, feature_dim), dtype=jnp.float32)

    # Small case (module's intended use; single grid step, block == full array).
    n_small = 16
    x_small = jax.random.normal(kx, (n_small, feature_dim), dtype=jnp.float32)
    out_small = jax.block_until_ready(
        soft_kmeans_forward(x_small, centroids, temperature))
    ref_small = soft_kmeans_reference(x_small, centroids, temperature)
    assert out_small.shape == (n_small, num_clusters)
    assert jnp.allclose(out_small, ref_small, atol=1e-5, rtol=1e-5)
    assert jnp.allclose(jnp.sum(out_small, axis=1), 1.0, atol=1e-5)

    # Larger, non-tile-multiple case with auto tile (ragged single block,
    # no jnp.pad) and with a forced small tile (multi-step ragged grid).
    n_big = 3000
    x_big = jax.random.normal(kx2, (n_big, feature_dim), dtype=jnp.float32)
    ref_big = soft_kmeans_reference(x_big, centroids, temperature)

    out_big_auto = jax.block_until_ready(
        soft_kmeans_forward(x_big, centroids, temperature))
    assert out_big_auto.shape == (n_big, num_clusters)
    assert jnp.allclose(out_big_auto, ref_big, atol=1e-5, rtol=1e-5)
    assert jnp.allclose(jnp.sum(out_big_auto, axis=1), 1.0, atol=1e-5)

    out_big_multi = jax.block_until_ready(
        soft_kmeans_forward(x_big, centroids, temperature, tm=512))
    assert out_big_multi.shape == (n_big, num_clusters)
    assert jnp.allclose(out_big_multi, ref_big, atol=1e-5, rtol=1e-5)
    assert jnp.allclose(jnp.sum(out_big_multi, axis=1), 1.0, atol=1e-5)

    print("KERNEL_OK")
</pallas_src>

<mosaic_0001>
module attributes {stable_mosaic.version = 11 : i64} {
  func.func @_softkmeans_kernel(%arg0: i32, %arg1: memref<16x32xf32, #tpu.memory_space<vmem>>, %arg2: memref<8x32xf32, #tpu.memory_space<vmem>>, %arg3: memref<8x1xf32, #tpu.memory_space<vmem>>, %arg4: memref<8x16xf32, #tpu.memory_space<vmem>>) attributes {dimension_semantics = [#tpu.dimension_semantics<parallel>], iteration_bounds = array<i64: 1>, scalar_prefetch = 0 : i64, scratch_operands = 0 : i64, tpu.core_type = #tpu.core_type<tc>, window_params = [{transform_indices = @transform_0, window_bounds = array<i64: 16, 32>}, {pipeline_mode = #tpu.pipeline_mode<synchronous>, transform_indices = @transform_1, window_bounds = array<i64: 8, 32>}, {pipeline_mode = #tpu.pipeline_mode<synchronous>, transform_indices = @transform_2, window_bounds = array<i64: 8, 1>}, {transform_indices = @transform_3, window_bounds = array<i64: 8, 16>}]} {
    %c0 = arith.constant 0 : index
    %c0_0 = arith.constant 0 : index
    %0 = vector.load %arg1[%c0, %c0_0] : memref<16x32xf32, #tpu.memory_space<vmem>>, vector<16x32xf32>
    %c0_1 = arith.constant 0 : index
    %c0_2 = arith.constant 0 : index
    %1 = vector.load %arg2[%c0_1, %c0_2] : memref<8x32xf32, #tpu.memory_space<vmem>>, vector<8x32xf32>
    %c0_3 = arith.constant 0 : index
    %c0_4 = arith.constant 0 : index
    %2 = vector.load %arg3[%c0_3, %c0_4] : memref<8x1xf32, #tpu.memory_space<vmem>>, vector<8x1xf32>
    %cst = arith.constant dense<0.000000e+00> : vector<8x16xf32>
    %3 = tpu.matmul %1, %0, %cst {dimension_numbers = #tpu.dot_dimension_numbers<[1], [1], [0], [0], [0, 0, 1, 0], [], []>} : vector<8x32xf32>, vector<16x32xf32>, vector<8x16xf32> -> vector<8x16xf32>
    %cst_5 = arith.constant 1.000000e+00 : f32
    %4 = vector.broadcast %cst_5 : f32 to vector<1x32xf32>
    %5 = arith.mulf %0, %0 : vector<16x32xf32>
    %cst_6 = arith.constant dense<0.000000e+00> : vector<1x16xf32>
    %6 = tpu.matmul %4, %5, %cst_6 {dimension_numbers = #tpu.dot_dimension_numbers<[1], [1], [0], [0], [0, 0, 1, 0], [], []>} : vector<1x32xf32>, vector<16x32xf32>, vector<1x16xf32> -> vector<1x16xf32>
    %7 = vector.broadcast %6 : vector<1x16xf32> to vector<8x16xf32>
    %8 = arith.addf %7, %3 : vector<8x16xf32>
    %9 = vector.broadcast %2 : vector<8x1xf32> to vector<8x16xf32>
    %10 = arith.addf %9, %8 : vector<8x16xf32>
    %cst_7 = arith.constant 0.000000e+00 : f32
    %11 = vector.broadcast %cst_7 : f32 to vector<8x16xf32>
    %12 = arith.maximumf %10, %11 : vector<8x16xf32>
    %13 = math.sqrt %12 : vector<8x16xf32>
    %cst_8 = arith.constant -1.000000e+00 : f32
    %14 = vector.broadcast %cst_8 : f32 to vector<8x16xf32>
    %15 = arith.mulf %13, %14 : vector<8x16xf32>
    %cst_9 = arith.constant dense<0xFF800000> : vector<16xf32>
    %16 = vector.multi_reduction <maximumf>, %15, %cst_9 [0] : vector<8x16xf32> to vector<16xf32>
    %17 = vector.shape_cast %16 : vector<16xf32> to vector<1x16xf32>
    %18 = vector.broadcast %17 : vector<1x16xf32> to vector<8x16xf32>
    %19 = arith.subf %15, %18 : vector<8x16xf32>
    %20 = math.exp %19 : vector<8x16xf32>
    %cst_10 = arith.constant dense<0.000000e+00> : vector<16xf32>
    %21 = vector.multi_reduction <add>, %20, %cst_10 [0] : vector<8x16xf32> to vector<16xf32>
    %22 = vector.shape_cast %21 : vector<16xf32> to vector<1x16xf32>
    %23 = tpu.reciprocal %22 {approx = true} : vector<1x16xf32> -> vector<1x16xf32>
    %24 = arith.mulf %22, %23 : vector<1x16xf32>
    %cst_11 = arith.constant 2.000000e+00 : f32
    %25 = vector.broadcast %cst_11 : f32 to vector<1x16xf32>
    %26 = arith.subf %25, %24 : vector<1x16xf32>
    %27 = arith.mulf %23, %26 : vector<1x16xf32>
    %28 = vector.broadcast %27 : vector<1x16xf32> to vector<8x16xf32>
    %29 = arith.mulf %20, %28 : vector<8x16xf32>
    %c0_12 = arith.constant 0 : index
    %c0_13 = arith.constant 0 : index
    %30 = vector.load %arg4[%c0_12, %c0_13] : memref<8x16xf32, #tpu.memory_space<vmem>>, vector<8x16xf32>
    tpu.vector_store %arg4[%c0_12, %c0_13], %29 {strides = array<i32>} : memref<8x16xf32, #tpu.memory_space<vmem>>, vector<8x16xf32>,
    return
  }
  func.func @transform_0(%arg0: i32) -> (i32, i32) {
    %c0_i32 = arith.constant 0 : i32
    %c0_i32_0 = arith.constant 0 : i32
    return %arg0, %c0_i32 : i32, i32
  }
  func.func @transform_1(%arg0: i32) -> (i32, i32) {
    %c0_i32 = arith.constant 0 : i32
    %c0_i32_0 = arith.constant 0 : i32
    %c0_i32_1 = arith.constant 0 : i32
    return %c0_i32, %c0_i32_0 : i32, i32
  }
  func.func @transform_2(%arg0: i32) -> (i32, i32) {
    %c0_i32 = arith.constant 0 : i32
    %c0_i32_0 = arith.constant 0 : i32
    %c0_i32_1 = arith.constant 0 : i32
    return %c0_i32, %c0_i32_0 : i32, i32
  }
  func.func @transform_3(%arg0: i32) -> (i32, i32) {
    %c0_i32 = arith.constant 0 : i32
    %c0_i32_0 = arith.constant 0 : i32
    return %c0_i32, %arg0 : i32, i32
  }
}

</mosaic_0001>

<bundles_post_ra>
// kernel: tpu_custom_call.1
= control target key start
LH: loop header
LB: loop body
LE: loop exit
PB: predicated region body
PF: predicated region fallthrough
CT: control target
= control target key end

     0   :  { %8 = vsyncpa [#allocation3], 0  ;;  %s413_s0 = inlined_call_operand.hbm [shape: f32[16,32], index: 0, kind: input, shape index: {}]   ;;  %s414_s1 = inlined_call_operand.vmem [shape: f32[8,32], index: 1, kind: input, shape index: {}]   ;;  %s415_s2 = inlined_call_operand.vmem [shape: f32[8,1], index: 2, kind: input, shape index: {}]   ;;  %s416_s3 = inlined_call_operand.hbm [shape: f32[8,16], index: 3, kind: output, shape index: {}]  }
   0x1   :  { %9 = vsyncpa [#allocation4], 0  ;;  %s351_s12 = smov [#allocation2]   ;;  %s303_s16 = scalar_lea.hbm %s413_s0, 256 }
   0x2   :  { %s15_s13 = sshll.u32 %s351_s12, 4  ;;  %p304_p0 = scmp.ne.s32.totalorder %s413_s0, %s303_s16  ;;  %s16_s13 = int_to_ptr.vmem [resolvable:$true] %s15_s13 }
   0x3   :  { %p307_p1 = scmp.lt.u32.totalorder %s303_s16, %s413_s0 }
   0x5   :  { %p309_p2 = pnand %p307_p1, %p304_p0 }
   0x7   :  { %312 = shalt.err (!%p309_p2)
}
   0x8   :  { %s313_s21 = scalar_lea.vmem %s16_s13, 256  ;;  %p318_p4 = scmp.lt.s32.totalorder %s16_s13, %s16_s13 }
   0x9   :  { %p314_p3 = scmp.ne.s32.totalorder %s16_s13, %s313_s21  ;;  %p319_p5 = scmp.lt.s32.totalorder %s313_s21, %s313_s21 }
   0xb   :  { %p320_p6 = por %p319_p5, %p318_p4 }
   0xd   :  { %p321_p7 = pnand %p320_p6, %p314_p3 }
   0xf   :  { %324 = shalt.err (!%p321_p7)
}
  0x10   :  { %s352_s22 = smov 128   ;;  %s353_s23 = smov 8  }
  0x11   :  { %21 = dma.hbm_to_vmem [thread:$0]  %s413_s0, 256, %s16_s13, [#allocation3], %s352_s22, %s352_s22, %s353_s23  }
  0x12   :  { %347 = dma.done.wait [#allocation3], 256  }
  0x13   :  { %348 = vsyncadd [#allocation3], 4294967040  ;;  %v354_v0 = vmov 0.0|0.0   ;;  %vm355_vm0 = vmmov 0   ;;  %v356_v1 = vmov 0.0   ;;  %v357_v2 = vmov 0  }
  0x14   :  { %283 = vmatprep.subr.bf16.mxu1 %v354_v0  ;;  %279 = vmatprep.subr.bf16.mxu0 %v354_v0  ;;  %vm33_vm1 = vcmask 261120   ;;  %v29_v3 = vld [vmem:[#allocation2] sm:$0xff]  ;;  %v30_v4 = vld [vmem:[#allocation2 + $0x8] sm:$0xff]  ;;  %v358_v11 = vmov 1.0   ;;  %v194_v12 = vlaneseq  ;;  %vm214_vm5 = vcmask 130048  }
  0x15   :  { %276 = vmatprep.mubr.msk.f32.mxu1 %vm355_vm0, %v356_v1  ;;  %269 = vmatprep.mubr.msk.f32.mxu0 %vm355_vm0, %v356_v1  ;;  %vm281_vm2 = vmpackc.low %vm33_vm1, %vm33_vm1  ;;  %v113_v5 = vmul.f32 %v29_v3, %v29_v3  ;;  %v114_v6 = vmul.f32 %v30_v4, %v30_v4  ;;  %v280_v7 = vpack.c.bf16 %v30_v4, %v29_v3  ;;  %v32_v8 = vld [vmem:[%s415_s2] sm:$0xff] }
  0x16   :  { %296 = vset.pattern.permute.xlu0 %v357_v2  ;;  %v31_v10 = vld [vmem:[%s414_s1] sm:$0xff]  ;;  %v195_v13 = vshrl.u32 %v194_v12, 7  ;;  %s359_s1 = smov [#allocation5]  }
  0x17   :  { %201 = vperm.xlu0 %296, %v32_v8   ;;  %v284_v9 = vpack.c.bf16 %v114_v6, %v113_v5  ;;  %282 = vmatpush3.bf16.xpose.msk.msra.mxu0 %vm281_vm2, %v280_v7  ;;  %s244_s2 = sshll.u32 %s359_s1, 4  ;;  %s245_s2 = int_to_ptr.vmem [resolvable:$true] %s244_s2 }
  0x18   :  { %v196_v14 = vsub.s32 0, %v195_v13  ;;  %s325_s29 = scalar_lea.vmem %s245_s2, 128  ;;  %p330_p9 = scmp.lt.s32.totalorder %s245_s2, %s245_s2 }
  0x19   :  { %286 = vmatpush3.bf16.xpose.msk.msra.mxu1 %vm281_vm2, %v284_v9  ;;  %p326_p8 = scmp.ne.s32.totalorder %s245_s2, %s325_s29  ;;  %p331_p10 = scmp.lt.s32.totalorder %s325_s29, %s325_s29 }
  0x1b   :  { %p332_p11 = por %p331_p10, %p330_p9 }
  0x1d   :  { %p333_p12 = pnand %p332_p11, %p326_p8 }
  0x1e   :  { %270 = vmatmul.mubr.msk.f32.vlgmr.msra.gmra.mrb[0].mxu0 %vm33_vm1, %v31_v10 }
  0x20   :  { %277 = vmatmul.mubr.msk.f32.vlgmr.msra.gmra.mrb[0].mxu1 %vm33_vm1, %v358_v11 }
  0x96   :  { %v202_v20 = vpop.permute.xlu0 %201 }
  0xf1   :  { %v109_v15 = vpop.f32.mrb[0].mxu0 }
  0xf2   :  { %v271_v16 = vpop.f32.mrb[1].mxu0 }
  0xf3   :  { %v190_v17 = vpop.f32.mrb[0].mxu1 }
  0xf4   :  { %v197_v18 = vrot.slane %v190_v17, %v196_v14  ;;  %v278_v19 = vpop.f32.mrb[1].mxu1 }
  0xf6   :  { %v198_v21 = vadd.f32 %v197_v18, %v109_v15 }
  0xf8   :  { %v204_v22 = vadd.f32 %v202_v20, %v198_v21 }
  0xfa   :  { %v205_v23 = vmax.f32 %v204_v22, 0.0 }
  0xfc   :  { %297 = vrsqrt.f32 %v205_v23  ;;  %vm208_vm3 = vcmp.eq.f32.partialorder %v205_v23, inf  ;;  %v211_v26 = vand.u32 2147483648, %v205_v23  ;;  %vm210_vm4 = vcmp.eq.f32.partialorder %v205_v23, 0.0 }
 0x106   :  { %v298_v24 = vpop.eup %297 }
 0x107   :  { %v207_v25 = vmul.f32 %v298_v24, %v205_v23 }
 0x109   :  { %v209_v27 = vsel %vm208_vm3, %v205_v23, %v207_v25 }
 0x10a   :  { %v212_v28 = vsel %vm210_vm4, %v211_v26, %v209_v27 }
 0x10b   :  { %v213_v29 = vmul.f32 -1.0, %v212_v28 }
 0x10d   :  { %v215_v30 = vsel %vm214_vm5, %v213_v29, -inf }
 0x10e   :  { %v216_v31 = vrot.slane %v215_v30, 4 }
 0x110   :  { %v217_v32 = vmax.f32 %v215_v30, %v216_v31 }
 0x112   :  { %v218_v33 = vrot.slane %v217_v32, 2 }
 0x114   :  { %v219_v34 = vmax.f32 %v217_v32, %v218_v33 }
 0x116   :  { %v220_v35 = vrot.slane %v219_v34, 1 }
 0x118   :  { %v221_v36 = vmax.f32 %v219_v34, %v220_v35 }
 0x11a   :  { %v222_v37 = vsub.f32 %v213_v29, %v221_v36 }
 0x11c   :  { %v223_v38 = vmul.f32 1.442695, %v222_v37 }
 0x11e   :  { %299 = vpow2.f32 %v223_v38 }
 0x128   :  { %v300_v39 = vpop.eup %299 }
 0x129   :  { %v225_v40 = vsel %vm214_vm5, %v300_v39, 0.0 }
 0x12a   :  { %v226_v41 = vrot.slane %v225_v40, 4 }
 0x12c   :  { %v227_v42 = vadd.f32 %v226_v41, %v225_v40 }
 0x12e   :  { %v228_v43 = vrot.slane %v227_v42, 2 }
 0x130   :  { %v229_v44 = vadd.f32 %v228_v43, %v227_v42 }
 0x132   :  { %v230_v45 = vrot.slane %v229_v44, 1 }
 0x134   :  { %v231_v46 = vadd.f32 %v230_v45, %v229_v44 }
 0x136   :  { %301 = vrcp.f32 %v231_v46 }
 0x140   :  { %v302_v47 = vpop.eup %301 }
 0x141   :  { %v233_v48 = vmul.f32 %v302_v47, %v231_v46 }
 0x143   :  { %v234_v49 = vsub.f32 2.0, %v233_v48 }
 0x145   :  { %v235_v50 = vmul.f32 %v302_v47, %v234_v49 }
 0x147   :  { %v236_v51 = vmul.f32 %v300_v39, %v235_v50 }
 0x149   :  { %237 = vst.msk [vmem:[#allocation5] sm:$0xff] %vm214_vm5, %v236_v51 }
 0x14a   :  { %336 = shalt.err (!%p333_p12)
}
 0x14b   :  { %s337_s5 = scalar_lea.hbm %s416_s3, 128 }
 0x14c   :  { %p338_p13 = scmp.ne.s32.totalorder %s416_s3, %s337_s5  ;;  %p341_p0 = scmp.lt.u32.totalorder %s337_s5, %s416_s3 }
 0x14e   :  { %p343_p1 = pnand %p341_p0, %p338_p13 }
 0x150   :  { %346 = shalt.err (!%p343_p1)
}
 0x151   :  { %247 = dma.vmem_to_hbm [thread:$0]  %s245_s2, 128, %s416_s3, [#allocation4]  }
 0x152   :  { %349 = dma.done.wait [#allocation4], 128  }
 0x153   :  { %350 = vsyncadd [#allocation4], 4294967168 }
 0x154   :  { %251 = vsyncpa [#allocation3], 1 }
 0x155   :  { %252 = vsyncpa [#allocation4], 1 }

</bundles_post_ra>
